<compile_context>
chip_gen: v5e
topology: v5e:2x2
jax: 0.10.0
libtpu: 0.0.40
codegen_flags: <defaults>
</compile_context>

<pallas_src>
import functools
import math

import jax
import jax.numpy as jnp
from jax.experimental import pallas as pl
from jax.experimental.pallas import tpu as pltpu

BN_EPS = 1e-5        # nn.BatchNorm1d default eps
MIN_ALPHA = 0.2      # ParamAttentionMixing defaults
MAX_ALPHA = 0.8


# ------------------------------ Pallas kernel -------------------------------

def _two_way_eca_kernel(scal_ref, x_ref, o_ref, *, C, K):
    """Fused TwoWayECA block.

    scal_ref : SMEM (2K + 3,) f32
               [conv_w[0,0,0..K-1] (avg taps), conv_w[0,1,0..K-1] (max taps),
                bn_scale, bn_shift, alpha]
    x_ref    : VMEM (B*C, H*W) f32   -- NCHW input viewed row-major
    o_ref    : VMEM (B*C, H*W) f32
    """
    x = x_ref[...]                                   # (BC, HW)
    BC = x.shape[0]
    pad = (K - 1) // 2

    # ---- spatial pooling: one lane-axis reduction each -> (BC, 1) columns.
    mean_col = jnp.mean(x, axis=1, keepdims=True)
    max_col = jnp.max(x, axis=1, keepdims=True)

    # ---- 'same' Conv1d(2 -> 1, k=K) over the channel axis, done as a masked
    # band-sum on the VPU.  rr = source row (sublanes), cc = dest row (lanes).
    rr = jax.lax.broadcasted_iota(jnp.int32, (BC, BC), 0)
    cc = jax.lax.broadcasted_iota(jnp.int32, (BC, BC), 1)
    dst_c = cc % C                                   # destination channel
    acc_t = jnp.zeros((BC, BC), jnp.float32)
    for t in range(K):
        d = t - pad                                  # source = dest + d
        w_avg = scal_ref[t]                          # scalar taps from SMEM
        w_max = scal_ref[K + t]
        valid = (rr - cc == d) & (dst_c + d >= 0) & (dst_c + d < C)
        acc_t = acc_t + jnp.where(valid,
                                  w_avg * mean_col + w_max * max_col, 0.0)
    conv_row = jnp.sum(acc_t, axis=0, keepdims=True)  # (1, BC), dest on lanes

    # ---- folded inference BatchNorm1d(1) + sigmoid.
    bn_scale = scal_ref[2 * K]
    bn_shift = scal_ref[2 * K + 1]
    alpha = scal_ref[2 * K + 2]
    z = conv_row * bn_scale + bn_shift
    atten_row = 1.0 / (1.0 + jnp.exp(-z))             # (1, BC)

    # ---- transpose (1, BC) -> (BC, 1) via diagonal select + lane reduction
    # (keeps everything on supported VPU/XLU ops; no relayout primitives).
    atten_col = jnp.sum(jnp.where(rr == cc, atten_row, 0.0),
                        axis=1, keepdims=True)        # (BC, 1)

    # ---- ParamAttentionMixing: x + alpha * x * (atten - 1); per-row broadcast.
    o_ref[...] = x + alpha * x * (atten_col - 1.0)


def two_way_eca_block(x_nchw, params):
    """TwoWayECABlock forward: (B, C, H, W) -> (B, C, H, W)."""
    B, C, H, W = x_nchw.shape
    w = params["conv_w"].astype(jnp.float32)          # (1, 2, K)
    K = w.shape[-1]

    # NCHW -> (B*C, H*W): a free view, lane axis = H*W (lane-dense).
    x2 = x_nchw.reshape(B * C, H * W).astype(jnp.float32)

    # Fold BatchNorm1d(1) running stats into a scalar scale/shift.
    bn = params["bn"]
    bn_scale = bn["gamma"] / jnp.sqrt(bn["var"] + BN_EPS)     # (1,)
    bn_shift = bn["beta"] - bn["mean"] * bn_scale             # (1,)
    alpha = jax.nn.sigmoid(params["alpha"]) * (MAX_ALPHA - MIN_ALPHA) + MIN_ALPHA

    scal = jnp.concatenate([
        w[0, 0, :], w[0, 1, :],
        bn_scale.reshape(1).astype(jnp.float32),
        bn_shift.reshape(1).astype(jnp.float32),
        jnp.reshape(alpha, (1,)).astype(jnp.float32),
    ]).astype(jnp.float32)                                    # (2K + 3,)

    out = pl.pallas_call(
        functools.partial(_two_way_eca_kernel, C=C, K=K),
        out_shape=jax.ShapeDtypeStruct((B * C, H * W), jnp.float32),
        grid=(1,),
        in_specs=[
            pl.BlockSpec(memory_space=pltpu.MemorySpace.SMEM),     # scalars
            pl.BlockSpec((B * C, H * W), lambda i: (0, 0)),        # activation
        ],
        out_specs=pl.BlockSpec((B * C, H * W), lambda i: (0, 0)),
    )(scal, x2)
    return out.reshape(B, C, H, W)


# ----------------------------- pure-JAX reference ----------------------------

def two_way_eca_reference(x, params):
    B, C, H, W = x.shape
    w = params["conv_w"]
    K = w.shape[-1]
    pad = (K - 1) // 2
    avg = jnp.mean(x, axis=(2, 3))                    # (B, C)
    mx = jnp.max(x, axis=(2, 3))                      # (B, C)
    stacked = jnp.stack([avg, mx], axis=1)            # (B, 2, C)
    sp = jnp.pad(stacked, ((0, 0), (0, 0), (pad, pad)))
    conv = jnp.zeros((B, C), jnp.float32)
    for i in range(2):
        for t in range(K):
            conv = conv + w[0, i, t] * sp[:, i, t:t + C]
    bn = params["bn"]
    scale = bn["gamma"][0] / jnp.sqrt(bn["var"][0] + BN_EPS)
    shift = bn["beta"][0] - bn["mean"][0] * scale
    atten = jax.nn.sigmoid(conv * scale + shift)      # (B, C)
    alpha = jax.nn.sigmoid(params["alpha"]) * (MAX_ALPHA - MIN_ALPHA) + MIN_ALPHA
    return x + alpha * x * (atten[:, :, None, None] - 1.0)


# ------------------------------ parameter init -------------------------------

def init_params(key, channels, gamma_hp=2.0, beta_hp=1.0):
    k_size = max(int((math.log2(channels) + beta_hp) / gamma_hp), 1)
    k_size = k_size if k_size % 2 else k_size + 1
    kw, kg, kb, km, kv = jax.random.split(key, 5)
    fan_in, fan_out = 2 * k_size, 1 * k_size          # xavier_normal_ on Conv1d
    std = math.sqrt(2.0 / (fan_in + fan_out))
    return dict(
        conv_w=jax.random.normal(kw, (1, 2, k_size), jnp.float32) * std,
        bn=dict(                                      # eval-mode running stats
            gamma=1.0 + 0.1 * jax.random.normal(kg, (1,), jnp.float32),
            beta=0.1 * jax.random.normal(kb, (1,), jnp.float32),
            mean=0.1 * jax.random.normal(km, (1,), jnp.float32),
            var=1.0 + 0.1 * jnp.abs(jax.random.normal(kv, (1,), jnp.float32)),
        ),
        alpha=jnp.float32(0.0),                       # nn.Parameter(0.0)
    )


# ------------------------------------ main -----------------------------------

if __name__ == "__main__":
    B, C, H, W = 2, 32, 16, 16                        # (B, C, N, M)

    key = jax.random.PRNGKey(0)
    pkey, xkey = jax.random.split(key)
    params = init_params(pkey, C)
    x = jax.random.normal(xkey, (B, C, H, W), jnp.float32)

    out = jax.jit(two_way_eca_block)(x, params)
    out = jax.block_until_ready(out)

    assert out.shape == (B, C, H, W), out.shape
    assert bool(jnp.all(jnp.isfinite(out)))

    ref = two_way_eca_reference(x, params)
    max_err = float(jnp.max(jnp.abs(out - ref)))
    assert jnp.allclose(out, ref, rtol=1e-4, atol=1e-4), max_err

    print("KERNEL_OK")
</pallas_src>

<mosaic_0001>
module attributes {stable_mosaic.version = 11 : i64} {
  func.func @_two_way_eca_kernel(%arg0: i32, %arg1: memref<9xf32, #tpu.memory_space<smem>>, %arg2: memref<64x256xf32, #tpu.memory_space<vmem>>, %arg3: memref<64x256xf32, #tpu.memory_space<vmem>>) attributes {dimension_semantics = [#tpu.dimension_semantics<arbitrary>], iteration_bounds = array<i64: 1>, scalar_prefetch = 0 : i64, scratch_operands = 0 : i64, tpu.core_type = #tpu.core_type<tc>, window_params = [{transform_indices = @transform_0, window_bounds = array<i64: 9>}, {pipeline_mode = #tpu.pipeline_mode<synchronous>, transform_indices = @transform_1, window_bounds = array<i64: 64, 256>}, {pipeline_mode = #tpu.pipeline_mode<synchronous>, transform_indices = @transform_2, window_bounds = array<i64: 64, 256>}]} {
    %c0 = arith.constant 0 : index
    %c0_0 = arith.constant 0 : index
    %0 = vector.load %arg2[%c0, %c0_0] : memref<64x256xf32, #tpu.memory_space<vmem>>, vector<64x256xf32>
    %cst = arith.constant dense<0.000000e+00> : vector<64xf32>
    %1 = vector.multi_reduction <add>, %0, %cst [1] : vector<64x256xf32> to vector<64xf32>
    %2 = vector.shape_cast %1 : vector<64xf32> to vector<64x1xf32>
    %cst_1 = arith.constant 2.560000e+02 : f32
    %3 = vector.broadcast %cst_1 : f32 to vector<64x1xf32>
    %4 = arith.divf %2, %3 : vector<64x1xf32>
    %cst_2 = arith.constant dense<0xFF800000> : vector<64xf32>
    %5 = vector.multi_reduction <maximumf>, %0, %cst_2 [1] : vector<64x256xf32> to vector<64xf32>
    %6 = vector.shape_cast %5 : vector<64xf32> to vector<64x1xf32>
    %7 = tpu.iota {dimensions = array<i32: 0>} : vector<64x64xi32>
    %8 = tpu.iota {dimensions = array<i32: 1>} : vector<64x64xi32>
    %c32_i32 = arith.constant 32 : i32
    %c0_i32 = arith.constant 0 : i32
    %9 = arith.cmpi eq, %c32_i32, %c0_i32 : i32
    %c1_i32 = arith.constant 1 : i32
    %10 = arith.select %9, %c1_i32, %c32_i32 : i32
    %11 = vector.broadcast %10 : i32 to vector<64x64xi32>
    %12 = arith.remsi %8, %11 : vector<64x64xi32>
    %c0_i32_3 = arith.constant 0 : i32
    %13 = vector.broadcast %c0_i32_3 : i32 to vector<64x64xi32>
    %14 = arith.cmpi ne, %12, %13 : vector<64x64xi32>
    %c0_i32_4 = arith.constant 0 : i32
    %15 = vector.broadcast %c0_i32_4 : i32 to vector<64x64xi32>
    %16 = arith.cmpi slt, %12, %15 : vector<64x64xi32>
    %c0_i32_5 = arith.constant 0 : i32
    %17 = arith.cmpi slt, %10, %c0_i32_5 : i32
    %18 = vector.broadcast %17 : i1 to vector<64x64xi1>
    %19 = vector.broadcast %18 : vector<64x64xi1> to vector<64x64xi1>
    %20 = arith.xori %16, %19 : vector<64x64xi1>
    %21 = arith.andi %20, %14 : vector<64x64xi1>
    %22 = vector.broadcast %10 : i32 to vector<64x64xi32>
    %23 = arith.addi %12, %22 : vector<64x64xi32>
    %24 = arith.select %21, %23, %12 : vector<64x64xi1>, vector<64x64xi32>
    %cst_6 = arith.constant 0.000000e+00 : f32
    %25 = vector.broadcast %cst_6 : f32 to vector<64x64xf32>
    %c0_7 = arith.constant 0 : index
    %26 = memref.load %arg1[%c0_7] : memref<9xf32, #tpu.memory_space<smem>>
    %c3 = arith.constant 3 : index
    %27 = memref.load %arg1[%c3] : memref<9xf32, #tpu.memory_space<smem>>
    %28 = arith.subi %7, %8 : vector<64x64xi32>
    %c-1_i32 = arith.constant -1 : i32
    %29 = vector.broadcast %c-1_i32 : i32 to vector<64x64xi32>
    %30 = arith.cmpi eq, %28, %29 : vector<64x64xi32>
    %c-1_i32_8 = arith.constant -1 : i32
    %31 = vector.broadcast %c-1_i32_8 : i32 to vector<64x64xi32>
    %32 = arith.addi %24, %31 : vector<64x64xi32>
    %c0_i32_9 = arith.constant 0 : i32
    %33 = vector.broadcast %c0_i32_9 : i32 to vector<64x64xi32>
    %34 = arith.cmpi sge, %32, %33 : vector<64x64xi32>
    %35 = arith.andi %30, %34 : vector<64x64xi1>
    %c-1_i32_10 = arith.constant -1 : i32
    %36 = vector.broadcast %c-1_i32_10 : i32 to vector<64x64xi32>
    %37 = arith.addi %24, %36 : vector<64x64xi32>
    %c32_i32_11 = arith.constant 32 : i32
    %38 = vector.broadcast %c32_i32_11 : i32 to vector<64x64xi32>
    %39 = arith.cmpi slt, %37, %38 : vector<64x64xi32>
    %40 = arith.andi %35, %39 : vector<64x64xi1>
    %41 = vector.broadcast %26 : f32 to vector<64x1xf32>
    %42 = arith.mulf %41, %4 : vector<64x1xf32>
    %43 = vector.broadcast %27 : f32 to vector<64x1xf32>
    %44 = arith.mulf %43, %6 : vector<64x1xf32>
    %45 = arith.addf %42, %44 : vector<64x1xf32>
    %cst_12 = arith.constant 0.000000e+00 : f32
    %46 = vector.shape_cast %45 : vector<64x1xf32> to vector<64x1xf32>
    %47 = vector.broadcast %46 : vector<64x1xf32> to vector<64x64xf32>
    %48 = vector.broadcast %cst_12 : f32 to vector<64x64xf32>
    %49 = arith.select %40, %47, %48 : vector<64x64xi1>, vector<64x64xf32>
    %50 = arith.addf %25, %49 : vector<64x64xf32>
    %c1 = arith.constant 1 : index
    %51 = memref.load %arg1[%c1] : memref<9xf32, #tpu.memory_space<smem>>
    %c4 = arith.constant 4 : index
    %52 = memref.load %arg1[%c4] : memref<9xf32, #tpu.memory_space<smem>>
    %53 = arith.subi %7, %8 : vector<64x64xi32>
    %c0_i32_13 = arith.constant 0 : i32
    %54 = vector.broadcast %c0_i32_13 : i32 to vector<64x64xi32>
    %55 = arith.cmpi eq, %53, %54 : vector<64x64xi32>
    %c0_i32_14 = arith.constant 0 : i32
    %56 = vector.broadcast %c0_i32_14 : i32 to vector<64x64xi32>
    %57 = arith.addi %24, %56 : vector<64x64xi32>
    %c0_i32_15 = arith.constant 0 : i32
    %58 = vector.broadcast %c0_i32_15 : i32 to vector<64x64xi32>
    %59 = arith.cmpi sge, %57, %58 : vector<64x64xi32>
    %60 = arith.andi %55, %59 : vector<64x64xi1>
    %c0_i32_16 = arith.constant 0 : i32
    %61 = vector.broadcast %c0_i32_16 : i32 to vector<64x64xi32>
    %62 = arith.addi %24, %61 : vector<64x64xi32>
    %c32_i32_17 = arith.constant 32 : i32
    %63 = vector.broadcast %c32_i32_17 : i32 to vector<64x64xi32>
    %64 = arith.cmpi slt, %62, %63 : vector<64x64xi32>
    %65 = arith.andi %60, %64 : vector<64x64xi1>
    %66 = vector.broadcast %51 : f32 to vector<64x1xf32>
    %67 = arith.mulf %66, %4 : vector<64x1xf32>
    %68 = vector.broadcast %52 : f32 to vector<64x1xf32>
    %69 = arith.mulf %68, %6 : vector<64x1xf32>
    %70 = arith.addf %67, %69 : vector<64x1xf32>
    %cst_18 = arith.constant 0.000000e+00 : f32
    %71 = vector.shape_cast %70 : vector<64x1xf32> to vector<64x1xf32>
    %72 = vector.broadcast %71 : vector<64x1xf32> to vector<64x64xf32>
    %73 = vector.broadcast %cst_18 : f32 to vector<64x64xf32>
    %74 = arith.select %65, %72, %73 : vector<64x64xi1>, vector<64x64xf32>
    %75 = arith.addf %50, %74 : vector<64x64xf32>
    %c2 = arith.constant 2 : index
    %76 = memref.load %arg1[%c2] : memref<9xf32, #tpu.memory_space<smem>>
    %c5 = arith.constant 5 : index
    %77 = memref.load %arg1[%c5] : memref<9xf32, #tpu.memory_space<smem>>
    %78 = arith.subi %7, %8 : vector<64x64xi32>
    %c1_i32_19 = arith.constant 1 : i32
    %79 = vector.broadcast %c1_i32_19 : i32 to vector<64x64xi32>
    %80 = arith.cmpi eq, %78, %79 : vector<64x64xi32>
    %c1_i32_20 = arith.constant 1 : i32
    %81 = vector.broadcast %c1_i32_20 : i32 to vector<64x64xi32>
    %82 = arith.addi %24, %81 : vector<64x64xi32>
    %c0_i32_21 = arith.constant 0 : i32
    %83 = vector.broadcast %c0_i32_21 : i32 to vector<64x64xi32>
    %84 = arith.cmpi sge, %82, %83 : vector<64x64xi32>
    %85 = arith.andi %80, %84 : vector<64x64xi1>
    %c1_i32_22 = arith.constant 1 : i32
    %86 = vector.broadcast %c1_i32_22 : i32 to vector<64x64xi32>
    %87 = arith.addi %24, %86 : vector<64x64xi32>
    %c32_i32_23 = arith.constant 32 : i32
    %88 = vector.broadcast %c32_i32_23 : i32 to vector<64x64xi32>
    %89 = arith.cmpi slt, %87, %88 : vector<64x64xi32>
    %90 = arith.andi %85, %89 : vector<64x64xi1>
    %91 = vector.broadcast %76 : f32 to vector<64x1xf32>
    %92 = arith.mulf %91, %4 : vector<64x1xf32>
    %93 = vector.broadcast %77 : f32 to vector<64x1xf32>
    %94 = arith.mulf %93, %6 : vector<64x1xf32>
    %95 = arith.addf %92, %94 : vector<64x1xf32>
    %cst_24 = arith.constant 0.000000e+00 : f32
    %96 = vector.shape_cast %95 : vector<64x1xf32> to vector<64x1xf32>
    %97 = vector.broadcast %96 : vector<64x1xf32> to vector<64x64xf32>
    %98 = vector.broadcast %cst_24 : f32 to vector<64x64xf32>
    %99 = arith.select %90, %97, %98 : vector<64x64xi1>, vector<64x64xf32>
    %100 = arith.addf %75, %99 : vector<64x64xf32>
    %cst_25 = arith.constant dense<0.000000e+00> : vector<64xf32>
    %101 = vector.multi_reduction <add>, %100, %cst_25 [0] : vector<64x64xf32> to vector<64xf32>
    %102 = vector.shape_cast %101 : vector<64xf32> to vector<1x64xf32>
    %c6 = arith.constant 6 : index
    %103 = memref.load %arg1[%c6] : memref<9xf32, #tpu.memory_space<smem>>
    %c7 = arith.constant 7 : index
    %104 = memref.load %arg1[%c7] : memref<9xf32, #tpu.memory_space<smem>>
    %c8 = arith.constant 8 : index
    %105 = memref.load %arg1[%c8] : memref<9xf32, #tpu.memory_space<smem>>
    %106 = vector.broadcast %103 : f32 to vector<1x64xf32>
    %107 = arith.mulf %102, %106 : vector<1x64xf32>
    %108 = vector.broadcast %104 : f32 to vector<1x64xf32>
    %109 = arith.addf %107, %108 : vector<1x64xf32>
    %cst_26 = arith.constant 0.000000e+00 : f32
    %110 = vector.broadcast %cst_26 : f32 to vector<1x64xf32>
    %111 = arith.subf %110, %109 : vector<1x64xf32>
    %112 = math.exp %111 : vector<1x64xf32>
    %cst_27 = arith.constant 1.000000e+00 : f32
    %113 = vector.broadcast %cst_27 : f32 to vector<1x64xf32>
    %114 = arith.addf %113, %112 : vector<1x64xf32>
    %cst_28 = arith.constant 1.000000e+00 : f32
    %115 = vector.broadcast %cst_28 : f32 to vector<1x64xf32>
    %116 = arith.divf %115, %114 : vector<1x64xf32>
    %117 = arith.cmpi eq, %7, %8 : vector<64x64xi32>
    %cst_29 = arith.constant 0.000000e+00 : f32
    %118 = vector.shape_cast %116 : vector<1x64xf32> to vector<1x64xf32>
    %119 = vector.broadcast %118 : vector<1x64xf32> to vector<64x64xf32>
    %120 = vector.broadcast %cst_29 : f32 to vector<64x64xf32>
    %121 = arith.select %117, %119, %120 : vector<64x64xi1>, vector<64x64xf32>
    %cst_30 = arith.constant dense<0.000000e+00> : vector<64xf32>
    %122 = vector.multi_reduction <add>, %121, %cst_30 [1] : vector<64x64xf32> to vector<64xf32>
    %123 = vector.shape_cast %122 : vector<64xf32> to vector<64x1xf32>
    %124 = vector.broadcast %105 : f32 to vector<64x256xf32>
    %125 = arith.mulf %124, %0 : vector<64x256xf32>
    %cst_31 = arith.constant 1.000000e+00 : f32
    %126 = vector.broadcast %cst_31 : f32 to vector<64x1xf32>
    %127 = arith.subf %123, %126 : vector<64x1xf32>
    %128 = vector.broadcast %127 : vector<64x1xf32> to vector<64x256xf32>
    %129 = arith.mulf %125, %128 : vector<64x256xf32>
    %130 = arith.addf %0, %129 : vector<64x256xf32>
    %c0_32 = arith.constant 0 : index
    %c0_33 = arith.constant 0 : index
    %131 = vector.load %arg3[%c0_32, %c0_33] : memref<64x256xf32, #tpu.memory_space<vmem>>, vector<64x256xf32>
    tpu.vector_store %arg3[%c0_32, %c0_33], %130 {strides = array<i32>} : memref<64x256xf32, #tpu.memory_space<vmem>>, vector<64x256xf32>,
    return
  }
  func.func @transform_0(%arg0: i32) -> i32 {
    %c0_i32 = arith.constant 0 : i32
    %c0_i32_0 = arith.constant 0 : i32
    return %c0_i32 : i32
  }
  func.func @transform_1(%arg0: i32) -> (i32, i32) {
    %c0_i32 = arith.constant 0 : i32
    %c0_i32_0 = arith.constant 0 : i32
    %c0_i32_1 = arith.constant 0 : i32
    return %c0_i32, %c0_i32_0 : i32, i32
  }
  func.func @transform_2(%arg0: i32) -> (i32, i32) {
    %c0_i32 = arith.constant 0 : i32
    %c0_i32_0 = arith.constant 0 : i32
    %c0_i32_1 = arith.constant 0 : i32
    return %c0_i32, %c0_i32_0 : i32, i32
  }
}

</mosaic_0001>

<bundles_post_ra>
// kernel: two_way_eca_block.1
= control target key start
LH: loop header
LB: loop body
LE: loop exit
PB: predicated region body
PF: predicated region fallthrough
CT: control target
= control target key end

     0   :  { %7 = vsyncpa [#allocation3], 0  ;;  %s550_s12 = smov [#allocation2]   ;;  %s1114_s0 = inlined_call_operand.vmem [shape: f32[9], index: 0, kind: input, shape index: {}]   ;;  %s1115_s1 = inlined_call_operand.vmem [shape: f32[64,256], index: 1, kind: input, shape index: {}]   ;;  %s1116_s2 = inlined_call_operand.vmem [shape: f32[64,256], index: 2, kind: output, shape index: {}]  }
   0x1   :  { %s13_s11 = sshll.u32 %s1114_s0, 4  ;;  %s14_s11 = int_to_ptr.vmem [resolvable:$true] %s13_s11 }
   0x2   :  { %16 = dma.vmem_to_smem %s14_s11, 16, %s550_s12, [#allocation3]  }
   0x3   :  { %548 = dma.done.wait [#allocation3], 16  }
   0x4   :  { %549 = vsyncadd [#allocation3], 4294967280 }
   0x5   :  { %23 = sfence }
   0x6   :  { %v573_v0 = vld [vmem:[%s1115_s1 + $0x20] sm:$0xff]  ;;  %v578_v1 = vld [vmem:[%s1115_s1 + $0x28] sm:$0xff]  ;;  %v583_v2 = vld [vmem:[%s1115_s1 + $0x10] sm:$0xff]  ;;  %v551_v32 = vmov 256.0   ;;  %v103_v35 = vlaneseq  ;;  %s513_s16 = sld [smem:[#allocation2 + $0x1]] }
   0x7   :  { %v46_v3 = vadd.f32 %v578_v1, %v573_v0  ;;  %v590_v4 = vld [vmem:[%s1115_s1 + $0x18] sm:$0xff]  ;;  %v595_v5 = vld [vmem:[%s1115_s1] sm:$0xff]  ;;  %v600_v6 = vld [vmem:[%s1115_s1 + $0x8] sm:$0xff]  ;;  %v85_v18 = vmax.f32 %v573_v0, %v578_v1  ;;  %530 = vrcp.f32 %v551_v32  ;;  %s515_s17 = sld [smem:[#allocation2 + $0x2]] }
   0x8   :  { %v82_v7 = vmax.f32 %v583_v2, %v590_v4  ;;  %v40_v8 = vadd.f32 %v600_v6, %v595_v5  ;;  %v609_v9 = vld [vmem:[%s1115_s1 + $0x30] sm:$0xff]  ;;  %v614_v10 = vld [vmem:[%s1115_s1 + $0x38] sm:$0xff]  ;;  %v79_v11 = vmax.f32 %v595_v5, %v600_v6  ;;  %v43_v13 = vadd.f32 %v590_v4, %v583_v2  ;;  %v625_v14 = vld [vmem:[%s1115_s1 + $0x40] sm:$0xff]  ;;  %s512_s18 = sld [smem:[#allocation2 + $0x3]] }
   0x9   :  { %47 = vadd.xlane.f32.xlu1 %v46_v3  ;;  %1127 = vst [vmem:[#allocation5_spill] sm:$0xff] %v614_v10  ;;  %v49_v12 = vadd.f32 %v614_v10, %v609_v9  ;;  %v630_v15 = vld [vmem:[%s1115_s1 + $0x48] sm:$0xff]  ;;  %v88_v17 = vmax.f32 %v609_v9, %v614_v10  ;;  %v641_v19 = vld [vmem:[%s1115_s1 + $0x60] sm:$0xff]  ;;  %v651_v21 = vld [vmem:[%s1115_s1 + $0x50] sm:$0xff]  ;;  %v682_v37 = vand.u32 127, %v103_v35  ;;  %v684_v39 = vshrl.u32 %v103_v35, 7 }
   0xa   :  { %83 = vmax.xlane.f32.xlu2 %v82_v7  ;;  %41 = vadd.xlane.f32.xlu0 %v40_v8  ;;  %v52_v16 = vadd.f32 %v630_v15, %v625_v14  ;;  %1128 = vst [vmem:[#allocation6_spill] sm:$0xff] %v641_v19  ;;  %v646_v20 = vld [vmem:[%s1115_s1 + $0x68] sm:$0xff]  ;;  %v656_v22 = vld [vmem:[%s1115_s1 + $0x58] sm:$0xff]  ;;  %v91_v23 = vmax.f32 %v625_v14, %v630_v15  ;;  %v667_v26 = vld [vmem:[%s1115_s1 + $0x70] sm:$0xff]  ;;  %s514_s0 = sld [smem:[#allocation2 + $0x4]] }
   0xb   :  { %1129 = vst [vmem:[#allocation7_spill] sm:$0xff] %v646_v20  ;;  %v58_v24 = vadd.f32 %v646_v20, %v641_v19  ;;  %v55_v25 = vadd.f32 %v656_v22, %v651_v21  ;;  %v672_v27 = vld [vmem:[%s1115_s1 + $0x78] sm:$0xff]  ;;  %v97_v29 = vmax.f32 %v641_v19, %v646_v20  ;;  %v94_v30 = vmax.f32 %v651_v21, %v656_v22  ;;  %s126_s1 = sld [smem:[#allocation2]] }
   0xc   :  { %1130 = vst [vmem:[#allocation8_spill] sm:$0xff] %v667_v26  ;;  %v61_v28 = vadd.f32 %v672_v27, %v667_v26  ;;  %v100_v31 = vmax.f32 %v667_v26, %v672_v27  ;;  %s516_s19 = sld [smem:[#allocation2 + $0x5]]  ;;  %v118_v41 = vand.u32 31, %v682_v37  ;;  %v688_v45 = vadd.s32 8, %v684_v39 }
   0xd   :  { %1131 = vst [vmem:[#allocation9_spill] sm:$0xff] %v672_v27  ;;  %v531_v33 = vpop.eup %530  ;;  %v692_v46 = vsub.s32 %v684_v39, %v682_v37  ;;  %v695_v47 = vadd.s32 24, %v684_v39  ;;  %v703_v51 = vstv %s513_s16  ;;  %v711_v54 = vstv %s515_s17  ;;  %s517_s20 = sld [smem:[#allocation2 + $0x6]] }
   0xe   :  { %v65_v34 = vmul.f32 256.0, %v531_v33  ;;  %vm69_vm0 = vweird.f32 %v531_v33  ;;  %v699_v49 = vadd.s32 4294967295, %v118_v41  ;;  %v705_v52 = vadd.s32 1, %v118_v41  ;;  %s518_s21 = sld [smem:[#allocation2 + $0x7]] }
   0xf   :  { %v709_v53 = vsub.s32 %v688_v45, %v682_v37  ;;  %v713_v55 = vstv %s512_s18  ;;  %v718_v57 = vadd.s32 16, %v684_v39  ;;  %vm136_vm1 = vcmp.eq.s32.totalorder %v692_v46, 4294967295  ;;  %s519_s22 = sld [smem:[#allocation2 + $0x8]] }
  0x10   :  { %v66_v36 = vsub.f32 1.0, %v65_v34  ;;  %v715_v56 = vstv %s514_s0  ;;  %v725_v59 = vsub.s32 %v695_v47, %v682_v37  ;;  %v728_v60 = vadd.s32 32, %v684_v39 }
  0x11   :  { %80 = vmax.xlane.f32.xlu1 %v79_v11  ;;  %v697_v48 = vstv %s126_s1  ;;  %vm145_vm2 = vcmp.ge.s32.totalorder %v699_v49, 0  ;;  %vm207_vm3 = vcmp.eq.s32.totalorder %v692_v46, 0  ;;  %vm277_vm4 = vcmp.eq.s32.totalorder %v692_v46, 1 }
  0x12   :  { %50 = vadd.xlane.f32.xlu2 %v49_v12  ;;  %44 = vadd.xlane.f32.xlu0 %v43_v13  ;;  %v67_v38 = vmul.f32 %v531_v33, %v66_v36  ;;  %v720_v58 = vstv %s516_s19  ;;  %vm295_vm5 = vcmp.lt.s32.totalorder %v705_v52, 32  ;;  %vm137_vm6 = vcmp.eq.s32.totalorder %v709_v53, 4294967295  ;;  %vm773_vm12 = vmand %vm136_vm1, %vm145_vm2 }
  0x13   :  { %vm208_vm7 = vcmp.eq.s32.totalorder %v709_v53, 0  ;;  %vm278_vm8 = vcmp.eq.s32.totalorder %v709_v53, 1  ;;  %v743_v12 = vsub.s32 %v718_v57, %v682_v37  ;;  %vm139_vm9 = vcmp.eq.s32.totalorder %v725_v59, 4294967295  ;;  %vm786_vm15 = vmand %vm137_vm6, %vm145_vm2 }
  0x14   :  { %v68_v42 = vadd.f32 %v531_v33, %v67_v38  ;;  %vm210_vm10 = vcmp.eq.s32.totalorder %v725_v59, 0  ;;  %v764_v34 = vadd.s32 40, %v684_v39  ;;  %vm803_vm6 = vmand %vm277_vm4, %vm295_vm5  ;;  %vm346_vm4 = vcmask 523264  }
  0x15   :  { %vm138_vm11 = vcmp.eq.s32.totalorder %v743_v12, 4294967295  ;;  %vm209_vm14 = vcmp.eq.s32.totalorder %v743_v12, 0 }
  0x16   :  { %v701_v50 = vsel %vm69_vm0, %v531_v33, %v68_v42  ;;  %vm279_vm0 = vcmp.eq.s32.totalorder %v743_v12, 1 }
  0x19   :  { %53 = vadd.xlane.f32.xlu1 %v52_v16 }
  0x1a   :  { %89 = vmax.xlane.f32.xlu2 %v88_v17  ;;  %86 = vmax.xlane.f32.xlu0 %v85_v18  ;;  %v750_v17 = vsub.s32 %v728_v60, %v682_v37 }
  0x1c   :  { %vm140_vm13 = vcmp.eq.s32.totalorder %v750_v17, 4294967295  ;;  %vm211_vm1 = vcmp.eq.s32.totalorder %v750_v17, 0 }
  0x21   :  { %92 = vmax.xlane.f32.xlu1 %v91_v23 }
  0x22   :  { %59 = vadd.xlane.f32.xlu2 %v58_v24  ;;  %56 = vadd.xlane.f32.xlu0 %v55_v25 }
  0x29   :  { %62 = vadd.xlane.f32.xlu1 %v61_v28 }
  0x2a   :  { %98 = vmax.xlane.f32.xlu2 %v97_v29  ;;  %95 = vmax.xlane.f32.xlu0 %v94_v30 }
  0x32   :  { %101 = vmax.xlane.f32.xlu0 %v100_v31  ;;  %v761_v31 = vadd.s32 48, %v684_v39 }
  0x7c   :  { %v48_v40 = vpop.xlane.xlu1 %47 }
  0x7d   :  { %v84_v43 = vpop.xlane.xlu2 %83  ;;  %v42_v44 = vpop.xlane.xlu0 %41  ;;  %v73_v13 = vmul.f32 %v701_v50, %v48_v40 }
  0x7e   :  { %v71_v61 = vmul.f32 %v701_v50, %v42_v44  ;;  %v174_v16 = vmul.f32 %v713_v55, %v84_v43  ;;  %v244_v28 = vmul.f32 %v715_v56, %v84_v43  ;;  %v315_v35 = vmul.f32 %v720_v58, %v84_v43 }
  0x7f   :  { %v166_v42 = vmul.f32 %v697_v48, %v73_v13  ;;  %v236_v43 = vmul.f32 %v703_v51, %v73_v13 }
  0x80   :  { %v164_v18 = vmul.f32 %v697_v48, %v71_v61  ;;  %v234_v23 = vmul.f32 %v703_v51, %v71_v61  ;;  %v305_v36 = vmul.f32 %v711_v54, %v71_v61 }
  0x84   :  { %v81_v62 = vpop.xlane.xlu1 %80 }
  0x85   :  { %v51_v63 = vpop.xlane.xlu2 %50  ;;  %v45_v3 = vpop.xlane.xlu0 %44  ;;  %v173_v7 = vmul.f32 %v713_v55, %v81_v62  ;;  %v243_v8 = vmul.f32 %v715_v56, %v81_v62  ;;  %v314_v29 = vmul.f32 %v720_v58, %v81_v62 }
  0x86   :  { %v72_v11 = vmul.f32 %v701_v50, %v45_v3  ;;  %v74_v24 = vmul.f32 %v701_v50, %v51_v63  ;;  %v307_v3 = vmul.f32 %v711_v54, %v73_v13 }
  0x87   :  { %v181_v32 = vadd.f32 %v173_v7, %v164_v18  ;;  %v251_v33 = vadd.f32 %v243_v8, %v234_v23  ;;  %v322_v8 = vadd.f32 %v314_v29, %v305_v36  ;;  %v797_v23 = vsub.s32 %v761_v31, %v682_v37 }
  0x88   :  { %v165_v25 = vmul.f32 %v697_v48, %v72_v11  ;;  %v235_v30 = vmul.f32 %v703_v51, %v72_v11  ;;  %v167_v44 = vmul.f32 %v697_v48, %v74_v24  ;;  %v306_v62 = vmul.f32 %v711_v54, %v72_v11 }
  0x89   :  { %v237_v7 = vmul.f32 %v703_v51, %v74_v24  ;;  %v189_v13 = vsel %vm773_vm12, %v181_v32, 0.0  ;;  %v815_v29 = vsub.s32 %v764_v34, %v682_v37  ;;  %v308_v46 = vmul.f32 %v711_v54, %v74_v24  ;;  %vm829_vm12 = vmand %vm278_vm8, %vm295_vm5 }
  0x8a   :  { %v182_v40 = vadd.f32 %v174_v16, %v165_v25  ;;  %v252_v41 = vadd.f32 %v244_v28, %v235_v30  ;;  %v259_v25 = vsel %vm207_vm3, %v251_v33, 0.0  ;;  %vm281_vm3 = vcmp.eq.s32.totalorder %v750_v17, 1  ;;  %vm853_vm8 = vmand %vm138_vm11, %vm145_vm2 }
  0x8b   :  { %v267_v20 = vadd.f32 %v259_v25, %v189_v13  ;;  %vm213_vm11 = vcmp.eq.s32.totalorder %v797_v23, 0 }
  0x8c   :  { %v54_v63 = vpop.xlane.xlu1 %53  ;;  %v190_v30 = vsel %vm786_vm15, %v182_v40, 0.0  ;;  %v260_v36 = vsel %vm208_vm7, %v252_v41, 0.0  ;;  %v323_v40 = vadd.f32 %v315_v35, %v306_v62  ;;  %vm840_vm7 = vmand %vm139_vm9, %vm145_vm2  ;;  %v847_v62 = vadd.s32 56, %v684_v39 }
  0x8d   :  { %v90_v16 = vpop.xlane.xlu2 %89  ;;  %v87_v18 = vpop.xlane.xlu0 %86  ;;  %v75_v32 = vmul.f32 %v701_v50, %v54_v63  ;;  %v330_v63 = vsel %vm803_vm6, %v322_v8, 0.0  ;;  %v268_v27 = vadd.f32 %v260_v36, %v190_v30  ;;  %vm142_vm9 = vcmp.eq.s32.totalorder %v797_v23, 4294967295  ;;  %vm888_vm15 = vmand %vm279_vm0, %vm295_vm5 }
  0x8e   :  { %v176_v28 = vmul.f32 %v713_v55, %v90_v16  ;;  %v246_v38 = vmul.f32 %v715_v56, %v90_v16  ;;  %v175_v41 = vmul.f32 %v713_v55, %v87_v18  ;;  %v245_v19 = vmul.f32 %v715_v56, %v87_v18 }
  0x8f   :  { %v317_v11 = vmul.f32 %v720_v58, %v90_v16  ;;  %v238_v13 = vmul.f32 %v703_v51, %v75_v32  ;;  %v309_v30 = vmul.f32 %v711_v54, %v75_v32  ;;  %vm283_vm0 = vcmp.eq.s32.totalorder %v797_v23, 1 }
  0x90   :  { %v184_v61 = vadd.f32 %v176_v28, %v167_v44  ;;  %v254_v53 = vadd.f32 %v246_v38, %v237_v7  ;;  %v183_v35 = vadd.f32 %v175_v41, %v166_v42  ;;  %v316_v44 = vmul.f32 %v720_v58, %v87_v18 }
  0x91   :  { %v168_v7 = vmul.f32 %v697_v48, %v75_v32  ;;  %v253_v42 = vadd.f32 %v245_v19, %v236_v43  ;;  %v331_v18 = vsel %vm829_vm12, %v323_v40, 0.0  ;;  %v338_v40 = vadd.f32 %v330_v63, %v267_v20 }
  0x92   :  { %v192_v25 = vsel %vm840_vm7, %v184_v61, 0.0  ;;  %v262_v28 = vsel %vm210_vm10, %v254_v53, 0.0  ;;  %v191_v33 = vsel %vm853_vm8, %v183_v35, 0.0  ;;  %v339_v61 = vadd.f32 %v331_v18, %v268_v27  ;;  %vm877_vm10 = vmand %vm140_vm13, %vm145_vm2 }
  0x93   :  { %v324_v24 = vadd.f32 %v316_v44, %v307_v3  ;;  %v261_v53 = vsel %vm209_vm14, %v253_v42, 0.0  ;;  %v325_v26 = vadd.f32 %v317_v11, %v308_v46  ;;  %vm1148_vm13 = vcmp.eq.s32.totalorder %v725_v59, 1  ;;  %vm913_vm7 = vmand %vm281_vm3, %vm295_vm5 }
  0x94   :  { %v93_v36 = vpop.xlane.xlu1 %92  ;;  %v269_v35 = vadd.f32 %v261_v53, %v191_v33  ;;  %vm896_vm6 = vmand %vm1148_vm13, %vm295_vm5  ;;  %v270_v3 = vadd.f32 %v262_v28, %v192_v25  ;;  %vm141_vm14 = vcmp.eq.s32.totalorder %v815_v29, 4294967295  ;;  %vm282_vm12 = vcmp.eq.s32.totalorder %v815_v29, 1 }
  0x95   :  { %v60_v16 = vpop.xlane.xlu2 %59  ;;  %v177_v38 = vmul.f32 %v713_v55, %v93_v36  ;;  %v247_v41 = vmul.f32 %v715_v56, %v93_v36  ;;  %v318_v19 = vmul.f32 %v720_v58, %v93_v36  ;;  %v57_v43 = vpop.xlane.xlu0 %56  ;;  %vm212_vm8 = vcmp.eq.s32.totalorder %v815_v29, 0  ;;  %vm955_vm3 = vmand %vm141_vm14, %vm145_vm2 }
  0x96   :  { %v77_v46 = vmul.f32 %v701_v50, %v60_v16  ;;  %v76_v59 = vmul.f32 %v701_v50, %v57_v43  ;;  %v348_v42 = vsel %vm346_vm4, %v339_v61, 0.0  ;;  %v333_v17 = vsel %vm896_vm6, %v325_v26, 0.0 }
  0x97   :  { %v185_v36 = vadd.f32 %v177_v38, %v168_v7  ;;  %v255_v10 = vadd.f32 %v247_v41, %v238_v13  ;;  %v326_v44 = vadd.f32 %v318_v19, %v309_v30  ;;  %v920_v7 = vsub.s32 %v847_v62, %v682_v37 }
  0x98   :  { %v347_v13 = vsel %vm346_vm4, %v338_v40, 0.0  ;;  %v341_v25 = vadd.f32 %v333_v17, %v270_v3  ;;  %v170_v28 = vmul.f32 %v697_v48, %v77_v46  ;;  %v240_v30 = vmul.f32 %v703_v51, %v77_v46 }
  0x99   :  { %v193_v12 = vsel %vm877_vm10, %v185_v36, 0.0  ;;  %v263_v63 = vsel %vm211_vm1, %v255_v10, 0.0  ;;  %v332_v10 = vsel %vm888_vm15, %v324_v24, 0.0  ;;  %v311_v16 = vmul.f32 %v711_v54, %v77_v46  ;;  %vm943_vm1 = vmand %vm142_vm9, %vm145_vm2 }
  0x9a   :  { %v271_v11 = vadd.f32 %v263_v63, %v193_v12  ;;  %v340_v18 = vadd.f32 %v332_v10, %v269_v35  ;;  %v334_v41 = vsel %vm913_vm7, %v326_v44, 0.0  ;;  %v169_v19 = vmul.f32 %v697_v48, %v76_v59  ;;  %vm970_vm10 = vmand %vm282_vm12, %vm295_vm5 }
  0x9b   :  { %v239_v43 = vmul.f32 %v703_v51, %v76_v59  ;;  %v310_v33 = vmul.f32 %v711_v54, %v76_v59  ;;  %v349_v46 = vadd.f32 %v348_v42, %v347_v13  ;;  %vm143_vm9 = vcmp.eq.s32.totalorder %v920_v7, 4294967295 }
  0x9c   :  { %v63_v38 = vpop.xlane.xlu1 %62  ;;  %v342_v61 = vadd.f32 %v334_v41, %v271_v11  ;;  %v350_v53 = vsel %vm346_vm4, %v340_v18, 0.0  ;;  %v352_v17 = vsel %vm346_vm4, %v341_v25, 0.0  ;;  %vm284_vm15 = vcmp.eq.s32.totalorder %v920_v7, 1  ;;  %vm153_vm13 = vmand %vm143_vm9, %vm145_vm2 }
  0x9d   :  { %v99_v40 = vpop.xlane.xlu2 %98  ;;  %v96_v26 = vpop.xlane.xlu0 %95  ;;  %v78_v59 = vmul.f32 %v701_v50, %v63_v38  ;;  %v351_v50 = vadd.f32 %v350_v53, %v349_v46  ;;  %vm214_vm6 = vcmp.eq.s32.totalorder %v920_v7, 0  ;;  %vm303_vm14 = vmand %vm284_vm15, %vm295_vm5  ;;  %vm395_vm7 = vcmp.eq.s32.totalorder %v688_v45, %v682_v37 }
  0x9e   :  { %v179_v24 = vmul.f32 %v713_v55, %v99_v40  ;;  %v249_v32 = vmul.f32 %v715_v56, %v99_v40  ;;  %v320_v35 = vmul.f32 %v720_v58, %v99_v40  ;;  %v178_v20 = vmul.f32 %v713_v55, %v96_v26 }
  0x9f   :  { %v248_v27 = vmul.f32 %v715_v56, %v96_v26  ;;  %v319_v3 = vmul.f32 %v720_v58, %v96_v26  ;;  %vm398_vm9 = vcmp.eq.s32.totalorder %v728_v60, %v682_v37  ;;  %vm400_vm15 = vcmp.eq.s32.totalorder %v761_v31, %v682_v37 }
  0xa0   :  { %v187_v12 = vadd.f32 %v179_v24, %v170_v28  ;;  %v257_v63 = vadd.f32 %v249_v32, %v240_v30  ;;  %v186_v8 = vadd.f32 %v178_v20, %v169_v19  ;;  %v354_v28 = vsel %vm346_vm4, %v342_v61, 0.0 }
  0xa1   :  { %v256_v11 = vadd.f32 %v248_v27, %v239_v43  ;;  %v327_v10 = vadd.f32 %v319_v3, %v310_v33  ;;  %v328_v30 = vadd.f32 %v320_v35, %v311_v16  ;;  %v171_v43 = vmul.f32 %v697_v48, %v78_v59 }
  0xa2   :  { %v195_v13 = vsel %vm943_vm1, %v187_v12, 0.0  ;;  %v265_v42 = vsel %vm213_vm11, %v257_v63, 0.0  ;;  %v194_v25 = vsel %vm955_vm3, %v186_v8, 0.0  ;;  %vm983_vm11 = vmand %vm283_vm0, %vm295_vm5  ;;  %v241_v33 = vmul.f32 %v703_v51, %v78_v59 }
  0xa3   :  { %v264_v38 = vsel %vm212_vm8, %v256_v11, 0.0  ;;  %v312_v16 = vmul.f32 %v711_v54, %v78_v59  ;;  %v273_v40 = vadd.f32 %v265_v42, %v195_v13  ;;  %v335_v29 = vsel %vm970_vm10, %v327_v10, 0.0 }
  0xa4   :  { %v272_v19 = vadd.f32 %v264_v38, %v194_v25  ;;  %v353_v61 = vadd.f32 %v352_v17, %v351_v50  ;;  %v336_v48 = vsel %vm983_vm11, %v328_v30, 0.0  ;;  %v371_v17 = vstv %s517_s20 }
  0xa5   :  { %v102_v26 = vpop.xlane.xlu0 %101  ;;  %v344_v20 = vadd.f32 %v336_v48, %v273_v40  ;;  %v373_v42 = vstv %s518_s21  ;;  %vm396_vm0 = vcmp.eq.s32.totalorder %v718_v57, %v682_v37  ;;  %vm394_vm8 = vcmp.eq.s32.totalorder %v684_v39, %v682_v37 }
  0xa6   :  { %v343_v23 = vadd.f32 %v335_v29, %v272_v19  ;;  %v180_v24 = vmul.f32 %v713_v55, %v102_v26  ;;  %v250_v32 = vmul.f32 %v715_v56, %v102_v26  ;;  %v321_v53 = vmul.f32 %v720_v58, %v102_v26 }
  0xa7   :  { %v355_v51 = vadd.f32 %v354_v28, %v353_v61  ;;  %v358_v46 = vsel %vm346_vm4, %v344_v20, 0.0  ;;  %vm399_vm3 = vcmp.eq.s32.totalorder %v764_v34, %v682_v37  ;;  %vm397_vm10 = vcmp.eq.s32.totalorder %v695_v47, %v682_v37 }
  0xa8   :  { %v356_v54 = vsel %vm346_vm4, %v343_v23, 0.0  ;;  %v188_v36 = vadd.f32 %v180_v24, %v171_v43  ;;  %v258_v35 = vadd.f32 %v250_v32, %v241_v33  ;;  %v329_v55 = vadd.f32 %v321_v53, %v312_v16 }
  0xa9   :  { %v357_v49 = vadd.f32 %v356_v54, %v355_v51  ;;  %vm401_vm11 = vcmp.eq.s32.totalorder %v847_v62, %v682_v37 }
  0xaa   :  { %v196_v56 = vsel %vm153_vm13, %v188_v36, 0.0  ;;  %v266_v58 = vsel %vm214_vm6, %v258_v35, 0.0  ;;  %v337_v3 = vsel %vm303_vm14, %v329_v55, 0.0 }
  0xab   :  { %v274_v27 = vadd.f32 %v266_v58, %v196_v56  ;;  %v359_v63 = vadd.f32 %v358_v46, %v357_v49  ;;  %v434_v56 = vstv %s519_s22 }
  0xac   :  { %v439_v58 = vmul.f32 %v434_v56, %v573_v0  ;;  %v440_v49 = vmul.f32 %v434_v56, %v578_v1  ;;  %v438_v62 = vmul.f32 %v434_v56, %v590_v4  ;;  %v435_v31 = vmul.f32 %v434_v56, %v595_v5 }
  0xad   :  { %v345_v12 = vadd.f32 %v337_v3, %v274_v27  ;;  %v437_v27 = vmul.f32 %v434_v56, %v583_v2  ;;  %v436_v46 = vmul.f32 %v434_v56, %v600_v6 }
  0xaf   :  { %v360_v44 = vsel %vm346_vm4, %v345_v12, 0.0 }
  0xb0   :  { %v361_v59 = vadd.f32 %v360_v44, %v359_v63 }
  0xb2   :  { %v362_v8 = vrot.slane %v361_v59, 4 }
  0xb4   :  { %v363_v11 = vadd.f32 %v362_v8, %v361_v59 }
  0xb6   :  { %v364_v52 = vrot.slane %v363_v11, 2 }
  0xb8   :  { %v365_v10 = vadd.f32 %v364_v52, %v363_v11 }
  0xba   :  { %v366_v7 = vrot.slane %v365_v10, 1 }
  0xbc   :  { %v367_v13 = vadd.f32 %v366_v7, %v365_v10 }
  0xbe   :  { %v372_v18 = vmul.f32 %v371_v17, %v367_v13 }
  0xc0   :  { %v374_v50 = vadd.f32 %v373_v42, %v372_v18 }
  0xc2   :  { %v375_v28 = vsub.f32 0.0, %v374_v50 }
  0xc4   :  { %v376_v30 = vmul.f32 1.442695, %v375_v28  ;;  %v445_v28 = vmul.f32 %v434_v56, %v651_v21 }
  0xc6   :  { %532 = vpow2.f32 %v376_v30 }
  0xcc   :  { %v533_v25 = vpop.eup %532 }
  0xcd   :  { %v378_v38 = vadd.f32 1.0, %v533_v25  ;;  %v446_v25 = vmul.f32 %v434_v56, %v656_v22 }
  0xcf   :  { %534 = vrcp.f32 %v378_v38  ;;  %v390_v33 = vand.u32 2147483648, %v378_v38  ;;  %v388_v40 = vand.u32 2147483647, %v378_v38  ;;  %vm384_vm5 = vweird.f32 %v378_v38 }
  0xd1   :  { %v391_v26 = vor.u32 1.1754944e-38, %v390_v33  ;;  %vm389_vm1 = vcmp.eq.f32.partialorder %v388_v40, 8.507059e+37 }
  0xd5   :  { %v535_v41 = vpop.eup %534 }
  0xd6   :  { %v380_v19 = vmul.f32 %v535_v41, %v378_v38  ;;  %vm385_vm2 = vweird.f32 %v535_v41  ;;  %v443_v38 = vmul.f32 %v434_v56, %v625_v14 }
  0xd7   :  { %vm386_vm12 = vmor %vm384_vm5, %vm385_vm2 }
  0xd8   :  { %v381_v43 = vsub.f32 1.0, %v380_v19  ;;  %v1161_v19 = vld [vmem:[#allocation5_spill] sm:$0xff] }
  0xda   :  { %v382_v16 = vmul.f32 %v535_v41, %v381_v43  ;;  %v442_v43 = vmul.f32 %v434_v56, %v1161_v19 }
  0xdc   :  { %v383_v29 = vadd.f32 %v535_v41, %v382_v16 }
  0xde   :  { %v387_v61 = vsel %vm386_vm12, %v535_v41, %v383_v29  ;;  %v441_v41 = vmul.f32 %v434_v56, %v609_v9 }
  0xdf   :  { %v392_v23 = vsel %vm389_vm1, %v391_v26, %v387_v61 }
  0xe0   :  { %v404_v24 = vsel %vm396_vm0, %v392_v23, 0.0  ;;  %v403_v32 = vsel %vm395_vm7, %v392_v23, 0.0  ;;  %v402_v53 = vsel %vm394_vm8, %v392_v23, 0.0  ;;  %v407_v39 = vsel %vm399_vm3, %v392_v23, 0.0 }
  0xe1   :  { %v416_v48 = vsel %vm346_vm4, %v404_v24, 0.0  ;;  %v413_v51 = vsel %vm346_vm4, %v403_v32, 0.0  ;;  %v410_v54 = vsel %vm346_vm4, %v402_v53, 0.0  ;;  %v406_v45 = vsel %vm398_vm9, %v392_v23, 0.0 }
  0xe2   :  { %417 = vadd.xlane.f32.xlu0 %v416_v48  ;;  %414 = vadd.xlane.f32.xlu2 %v413_v51  ;;  %v405_v57 = vsel %vm397_vm10, %v392_v23, 0.0  ;;  %v425_v36 = vsel %vm346_vm4, %v407_v39, 0.0  ;;  %v422_v35 = vsel %vm346_vm4, %v406_v45, 0.0  ;;  %v409_v60 = vsel %vm401_vm11, %v392_v23, 0.0  ;;  %v1162_v39 = vld [vmem:[#allocation8_spill] sm:$0xff] }
  0xe3   :  { %411 = vadd.xlane.f32.xlu1 %v410_v54  ;;  %v419_v55 = vsel %vm346_vm4, %v405_v57, 0.0  ;;  %v408_v47 = vsel %vm400_vm15, %v392_v23, 0.0  ;;  %v431_v34 = vsel %vm346_vm4, %v409_v60, 0.0  ;;  %v449_v45 = vmul.f32 %v434_v56, %v1162_v39  ;;  %v1163_v57 = vld [vmem:[#allocation9_spill] sm:$0xff] }
  0xe4   :  { %v428_v20 = vsel %vm346_vm4, %v408_v47, 0.0 }
  0xea   :  { %426 = vadd.xlane.f32.xlu0 %v425_v36  ;;  %423 = vadd.xlane.f32.xlu2 %v422_v35  ;;  %v450_v36 = vmul.f32 %v434_v56, %v1163_v57 }
  0xeb   :  { %420 = vadd.xlane.f32.xlu1 %v419_v55 }
  0xf2   :  { %432 = vadd.xlane.f32.xlu2 %v431_v34 }
  0xf3   :  { %429 = vadd.xlane.f32.xlu1 %v428_v20 }
 0x155   :  { %v418_v3 = vpop.xlane.xlu0 %417  ;;  %v415_v37 = vpop.xlane.xlu2 %414 }
 0x156   :  { %v522_v12 = vadd.f32 -1.0, %v418_v3  ;;  %v521_v63 = vadd.f32 -1.0, %v415_v37  ;;  %v412_v44 = vpop.xlane.xlu1 %411 }
 0x157   :  { %v520_v59 = vadd.f32 -1.0, %v412_v44 }
 0x158   :  { %v463_v8 = vmul.f32 %v522_v12, %v439_v58  ;;  %v464_v11 = vmul.f32 %v522_v12, %v440_v49  ;;  %v461_v52 = vmul.f32 %v521_v63, %v437_v27  ;;  %v462_v10 = vmul.f32 %v521_v63, %v438_v62 }
 0x159   :  { %v459_v7 = vmul.f32 %v520_v59, %v435_v31  ;;  %v460_v17 = vmul.f32 %v520_v59, %v436_v46 }
 0x15a   :  { %v479_v13 = vadd.f32 %v463_v8, %v573_v0  ;;  %v480_v42 = vadd.f32 %v464_v11, %v578_v1  ;;  %v477_v18 = vadd.f32 %v461_v52, %v583_v2  ;;  %v478_v50 = vadd.f32 %v462_v10, %v590_v4 }
 0x15b   :  { %v475_v30 = vadd.f32 %v459_v7, %v595_v5  ;;  %v444_v0 = vmul.f32 %v434_v56, %v630_v15  ;;  %v476_v1 = vadd.f32 %v460_v17, %v600_v6 }
 0x15c   :  { %495 = vst [vmem:[%s1116_s2 + $0x20] sm:$0xff] %v479_v13 }
 0x15d   :  { %496 = vst [vmem:[%s1116_s2 + $0x28] sm:$0xff] %v480_v42  ;;  %v427_v2 = vpop.xlane.xlu0 %426  ;;  %v424_v4 = vpop.xlane.xlu2 %423 }
 0x15e   :  { %493 = vst [vmem:[%s1116_s2 + $0x10] sm:$0xff] %v477_v18  ;;  %v525_v5 = vadd.f32 -1.0, %v427_v2  ;;  %v524_v33 = vadd.f32 -1.0, %v424_v4  ;;  %v421_v16 = vpop.xlane.xlu1 %420 }
 0x15f   :  { %494 = vst [vmem:[%s1116_s2 + $0x18] sm:$0xff] %v478_v50  ;;  %v523_v40 = vadd.f32 -1.0, %v421_v16 }
 0x160   :  { %491 = vst [vmem:[%s1116_s2] sm:$0xff] %v475_v30  ;;  %v469_v6 = vmul.f32 %v525_v5, %v445_v28  ;;  %v470_v29 = vmul.f32 %v525_v5, %v446_v25  ;;  %v467_v26 = vmul.f32 %v524_v33, %v443_v38  ;;  %v468_v61 = vmul.f32 %v524_v33, %v444_v0 }
 0x161   :  { %492 = vst [vmem:[%s1116_s2 + $0x8] sm:$0xff] %v476_v1  ;;  %v465_v23 = vmul.f32 %v523_v40, %v441_v41  ;;  %v466_v24 = vmul.f32 %v523_v40, %v442_v43 }
 0x162   :  { %v485_v32 = vadd.f32 %v469_v6, %v651_v21  ;;  %v486_v53 = vadd.f32 %v470_v29, %v656_v22  ;;  %v483_v48 = vadd.f32 %v467_v26, %v625_v14  ;;  %v484_v51 = vadd.f32 %v468_v61, %v630_v15  ;;  %v1164_v14 = vld [vmem:[#allocation6_spill] sm:$0xff]  ;;  %v1165_v15 = vld [vmem:[#allocation7_spill] sm:$0xff] }
 0x163   :  { %v481_v54 = vadd.f32 %v465_v23, %v609_v9  ;;  %v482_v21 = vadd.f32 %v466_v24, %v1161_v19  ;;  %v447_v35 = vmul.f32 %v434_v56, %v1164_v14  ;;  %v448_v55 = vmul.f32 %v434_v56, %v1165_v15 }
 0x164   :  { %501 = vst [vmem:[%s1116_s2 + $0x50] sm:$0xff] %v485_v32 }
 0x165   :  { %502 = vst [vmem:[%s1116_s2 + $0x58] sm:$0xff] %v486_v53  ;;  %v433_v22 = vpop.xlane.xlu2 %432 }
 0x166   :  { %499 = vst [vmem:[%s1116_s2 + $0x40] sm:$0xff] %v483_v48  ;;  %v527_v9 = vadd.f32 -1.0, %v433_v22  ;;  %v430_v60 = vpop.xlane.xlu1 %429 }
 0x167   :  { %500 = vst [vmem:[%s1116_s2 + $0x48] sm:$0xff] %v484_v51  ;;  %v526_v47 = vadd.f32 -1.0, %v430_v60 }
 0x168   :  { %497 = vst [vmem:[%s1116_s2 + $0x30] sm:$0xff] %v481_v54  ;;  %v473_v34 = vmul.f32 %v527_v9, %v449_v45  ;;  %v474_v20 = vmul.f32 %v527_v9, %v450_v36 }
 0x169   :  { %498 = vst [vmem:[%s1116_s2 + $0x38] sm:$0xff] %v482_v21  ;;  %v471_v56 = vmul.f32 %v526_v47, %v447_v35  ;;  %v472_v58 = vmul.f32 %v526_v47, %v448_v55 }
 0x16a   :  { %v489_v49 = vadd.f32 %v473_v34, %v1162_v39  ;;  %v490_v27 = vadd.f32 %v474_v20, %v1163_v57 }
 0x16b   :  { %v487_v62 = vadd.f32 %v471_v56, %v1164_v14  ;;  %v488_v3 = vadd.f32 %v472_v58, %v1165_v15 }
 0x16c   :  { %505 = vst [vmem:[%s1116_s2 + $0x70] sm:$0xff] %v489_v49 }
 0x16d   :  { %506 = vst [vmem:[%s1116_s2 + $0x78] sm:$0xff] %v490_v27 }
 0x16e   :  { %503 = vst [vmem:[%s1116_s2 + $0x60] sm:$0xff] %v487_v62 }
 0x16f   :  { %504 = vst [vmem:[%s1116_s2 + $0x68] sm:$0xff] %v488_v3 }
 0x170   :  { %511 = vsyncpa [#allocation3], 1 }

</bundles_post_ra>
